<compile_context>
chip_gen: v6e
topology: v6e:2x2x1
jax: 0.10.0
libtpu: 0.0.40
codegen_flags: <defaults>
</compile_context>

<pallas_src>
import math
import functools

import numpy as np
import jax
import jax.numpy as jnp
from jax import lax
from jax.experimental import pallas as pl
from jax.experimental.pallas import tpu as pltpu


# ----------------------------------------------------------------------------- helpers
def _dot_nt(a, b):
    # a: (M, D), b: (N, D) -> (M, N), contraction over the last dims (no explicit .T)
    return lax.dot_general(a, b, (((1,), (1,)), ((), ())),
                           preferred_element_type=jnp.float32)


# ----------------------------------------------------------------------------- roll-shear probe
_ROLL_OK = None


def _probe_kernel(x_ref, o_ref):
    o_ref[...] = pltpu.roll(x_ref[...], 113, 1, stride=1, stride_axis=0)


def _roll_shear_supported():
    """Probe the per-row strided lane-roll (the XLU shear used for the c2p/p2c gathers).

    If the op is unsupported or its semantics do not match jnp.roll-per-row, we fall back to
    the fused bf16 one-hot path.
    """
    global _ROLL_OK
    if _ROLL_OK is None:
        try:
            x = jnp.broadcast_to(jnp.arange(128, dtype=jnp.float32), (8, 128))
            got = pl.pallas_call(
                _probe_kernel,
                out_shape=jax.ShapeDtypeStruct((8, 128), jnp.float32),
            )(x)
            want = np.stack([np.roll(np.arange(128, dtype=np.float32), 113 + r)
                             for r in range(8)])
            _ROLL_OK = bool(np.allclose(np.asarray(got), want))
        except Exception:
            _ROLL_OK = False
    return _ROLL_OK


# ----------------------------------------------------------------------------- fused linear kernel
def _linear_kernel(x_ref, w_ref, b_ref, o_ref):
    # x: (TR, in), w: (out, in) (PyTorch nn.Linear layout), b: (1, out); f32 accumulation.
    o_ref[...] = lax.dot_general(
        x_ref[...], w_ref[...], (((1,), (1,)), ((), ())),
        preferred_element_type=jnp.float32) + b_ref[...]


def pallas_linear(x, w, b, *, compute_dtype=jnp.float32, row_block=256):
    """Row-tiled y = x @ w^T + b.  Weights/activations may be bf16; accumulate/output f32."""
    R, In = x.shape
    Out = w.shape[0]
    TR = min(R, row_block)
    Rp = ((R + TR - 1) // TR) * TR
    xp = x if Rp == R else jnp.pad(x, ((0, Rp - R), (0, 0)))
    out = pl.pallas_call(
        _linear_kernel,
        out_shape=jax.ShapeDtypeStruct((Rp, Out), jnp.float32),
        grid_spec=pltpu.PrefetchScalarGridSpec(
            num_scalar_prefetch=0,
            grid=(Rp // TR,),
            in_specs=[
                pl.BlockSpec((TR, In), lambda r: (r, 0)),
                pl.BlockSpec((Out, In), lambda r: (0, 0)),
                pl.BlockSpec((1, Out), lambda r: (0, 0)),
            ],
            out_specs=pl.BlockSpec((TR, Out), lambda r: (r, 0)),
        ),
        compiler_params=pltpu.CompilerParams(
            dimension_semantics=("parallel",)),
    )(xp.astype(compute_dtype), w.astype(compute_dtype),
      b.reshape(1, Out).astype(jnp.float32))
    return out if Rp == R else out[:R]


# ----------------------------------------------------------------------------- attention kernel
def _attn_kernel(q_ref, k_ref, v_ref, pk_ref, pq_ref, mask_ref, *rest,
                 att_span, with_probs, use_roll):
    S = att_span
    if use_roll:
        out_refs = rest
    else:
        oh_ref, out_refs = rest[0], rest[1:]

    q = q_ref[0]          # (Lq, d)   (1/sqrt(3d) already folded in)
    k = k_ref[0]          # (Lk, d)
    v = v_ref[0]          # (Lk, d)
    pk = pk_ref[0]        # (P, d)    roll: reversed+padded pos_k ; fallback: raw pos_k
    pq = pq_ref[0]        # (P, d)    pos_q (pre-scaled), padded on the roll path
    m = mask_ref[0]       # (Lq, Lk)
    Lq, Lk = q.shape[0], k.shape[0]
    P = pk.shape[0]

    # content-to-content (MXU, f32 accumulation)
    scores = _dot_nt(q, k)                        # (Lq, Lk)

    cmat = _dot_nt(q, pk)                         # (Lq, P)
    nmat = _dot_nt(k, pq)                         # (Lk, P)  nmat[j, r] = k_j . pos_q_r

    if use_roll:
        # ---- c2p: cmat = q @ reversed(padded pos_k)^T; per-row lane roll so that
        #      column j of row i picks relative index clamp(i - j + S).
        c2p_sh = pltpu.roll(cmat, S + 1, 1, stride=1, stride_axis=0)
        ii = lax.broadcasted_iota(jnp.int32, (Lq, P), 0)
        jj = lax.broadcasted_iota(jnp.int32, (Lq, P), 1)
        rel = ii - jj
        # clamp fix-ups (only active when |i-j| > S, i.e. L > S)
        c2p_sh = jnp.where(rel >= S, cmat[:, P - 2 * S:P - 2 * S + 1], c2p_sh)
        c2p_sh = jnp.where(rel < -S, cmat[:, P - 1:P], c2p_sh)
        c2p = c2p_sh[:, :Lk]

        # ---- p2c (computed transposed): per-row roll of nmat so column i of row j picks
        #      relative index clamp(i - j + S).
        p2c_sh = pltpu.roll(nmat, P - S, 1, stride=1, stride_axis=0)
        jj2 = lax.broadcasted_iota(jnp.int32, (Lk, P), 0)
        ii2 = lax.broadcasted_iota(jnp.int32, (Lk, P), 1)
        rel2 = ii2 - jj2
        p2c_sh = jnp.where(rel2 >= S, nmat[:, 2 * S - 1:2 * S], p2c_sh)
        p2c_sh = jnp.where(rel2 < -S, nmat[:, 0:1], p2c_sh)
        p2c_t = p2c_sh[:, :Lq]                    # (Lk, Lq), p2c_t[j, i] = p2c[i, j]

        # transpose via an identity matmul on the MXU (exact; tiny here).
        # TODO(synk): for large L replace with an XLU transpose to avoid the L^3 identity matmul.
        ri = lax.broadcasted_iota(jnp.int32, (Lq, Lq), 0)
        ci = lax.broadcasted_iota(jnp.int32, (Lq, Lq), 1)
        eye = (ri == ci).astype(jnp.float32)
        p2c = lax.dot_general(eye, p2c_t, (((1,), (1,)), ((), ())),
                              preferred_element_type=jnp.float32)

        scores = scores + c2p + p2c
    else:
        # Stopgap (reviewer-sanctioned): single fused reduce against a bf16 one-hot.
        oh = oh_ref[...].astype(jnp.float32)      # (Lq, Lk, 2S)
        bias = jnp.sum(oh * (cmat[:, None, :] + nmat[None, :, :]), axis=-1)
        scores = scores + bias

    # module semantics: logits = scores - rowmax (over all keys, pre-mask)
    scores = scores - jnp.max(scores, axis=-1, keepdims=True)

    # XSoftmax: scores are already <= 0, so exp is safe; one select, guarded denominator
    # (fully-masked rows -> probs exactly 0, matching torch's masked_fill(0)).
    valid = m > 0.0
    e = jnp.where(valid, jnp.exp(scores), 0.0)
    denom = jnp.maximum(jnp.sum(e, axis=-1, keepdims=True), 1e-30)
    probs = e / denom

    ctx = jnp.dot(probs.astype(v.dtype), v, preferred_element_type=jnp.float32)
    out_refs[0][0] = ctx.astype(out_refs[0].dtype)
    if with_probs:
        out_refs[1][0] = probs
        out_refs[2][0] = scores


def disentangled_attention(q, k, v, pos_k, pos_q, mask, *, att_span, num_heads,
                           return_probs, use_roll, onehot=None):
    BH, L, d = q.shape
    H = num_heads
    P = pos_k.shape[1]
    kernel = functools.partial(_attn_kernel, att_span=att_span,
                               with_probs=return_probs, use_roll=use_roll)

    out_shape = [jax.ShapeDtypeStruct((BH, L, d), jnp.float32)]
    out_specs = [pl.BlockSpec((1, L, d), lambda s: (s, 0, 0))]
    if return_probs:
        out_shape += [jax.ShapeDtypeStruct((BH, L, L), jnp.float32),
                      jax.ShapeDtypeStruct((BH, L, L), jnp.float32)]
        out_specs += [pl.BlockSpec((1, L, L), lambda s: (s, 0, 0)),
                      pl.BlockSpec((1, L, L), lambda s: (s, 0, 0))]

    in_specs = [
        pl.BlockSpec((1, L, d), lambda s: (s, 0, 0)),        # q
        pl.BlockSpec((1, L, d), lambda s: (s, 0, 0)),        # k
        pl.BlockSpec((1, L, d), lambda s: (s, 0, 0)),        # v
        pl.BlockSpec((1, P, d), lambda s: (s % H, 0, 0)),    # pos_k (per head)
        pl.BlockSpec((1, P, d), lambda s: (s % H, 0, 0)),    # pos_q (per head)
        pl.BlockSpec((1, L, L), lambda s: (s // H, 0, 0)),   # mask (resident across H steps)
    ]
    args = [q, k, v, pos_k, pos_q, mask]
    if not use_roll:
        in_specs.append(pl.BlockSpec((L, L, P), lambda s: (0, 0, 0)))
        args.append(onehot)

    outs = pl.pallas_call(
        kernel,
        out_shape=tuple(out_shape),
        grid_spec=pltpu.PrefetchScalarGridSpec(
            num_scalar_prefetch=0,
            grid=(BH,),                    # flattened (B, H): megacore-shardable
            in_specs=in_specs,
            out_specs=tuple(out_specs),
        ),
        compiler_params=pltpu.CompilerParams(
            dimension_semantics=("parallel",)),
    )(*args)

    if return_probs:
        return outs[0], outs[1], outs[2]
    return outs[0], None, None


# ----------------------------------------------------------------------------- module forward (glue)
def forward(params, hidden_states, attention_mask, rel_embeddings, *,
            num_heads, head_dim, att_span, compute_dtype=jnp.float32,
            return_probs=True):
    B, L, hid = hidden_states.shape
    H, d = num_heads, head_dim
    cd = compute_dtype
    scale = 1.0 / math.sqrt(d * 3)        # scale_factor = 3 (content + c2p + p2c)

    # ---- fused QKV projection (one x tile feeds one wide matmul)
    x = hidden_states.reshape(B * L, hid)
    wqkv = jnp.concatenate([params["wq"], params["wk"], params["wv"]], axis=0)
    bqkv = jnp.concatenate([params["bq"], params["bk"], params["bv"]], axis=0)
    qkv = pallas_linear(x, wqkv, bqkv, compute_dtype=cd)
    qf, kf, vf = jnp.split(qkv, 3, axis=1)

    def t4s(y):   # (B*L, H*d) -> (B*H, L, d)
        return y.reshape(B, L, H, d).transpose(0, 2, 1, 3).reshape(B * H, L, d)

    q = t4s(qf) * scale                    # fold scale into q (covers content + c2p)
    k = t4s(kf)
    v = t4s(vf)

    # ---- fused positional projections
    wpos = jnp.concatenate([params["wpk"], params["wpq"]], axis=0)
    bpos = jnp.concatenate([params["bpk"], params["bpq"]], axis=0)
    pos = pallas_linear(rel_embeddings, wpos, bpos, compute_dtype=cd)
    pkf, pqf = jnp.split(pos, 2, axis=1)
    S2 = 2 * att_span
    pk = pkf.reshape(S2, H, d).transpose(1, 0, 2)            # (H, 2S, d)
    pq = pqf.reshape(S2, H, d).transpose(1, 0, 2) * scale    # p2c scale folded in

    use_roll = _roll_shear_supported()
    onehot = None
    if use_roll:
        # pad the relative axis to a lane-dense multiple of 128; pre-flip pos_k so the
        # in-kernel c2p shear is a single strided lane-roll.
        P = max(128, ((S2 + 127) // 128) * 128)
        pad = P - S2
        pk_in = jnp.pad(pk, ((0, 0), (0, pad), (0, 0)))[:, ::-1, :]
        pq_in = jnp.pad(pq, ((0, 0), (0, pad), (0, 0)))
    else:
        pk_in, pq_in = pk, pq
        relpos = jnp.arange(L)[:, None] - jnp.arange(L)[None, :]
        c2p_pos = jnp.clip(relpos + att_span, 0, S2 - 1)
        onehot = (c2p_pos[:, :, None] == jnp.arange(S2)[None, None, :]).astype(jnp.bfloat16)

    ctx, probs, logits = disentangled_attention(
        q.astype(cd), k.astype(cd), v.astype(cd),
        pk_in.astype(cd), pq_in.astype(cd),
        attention_mask.astype(jnp.float32),
        att_span=att_span, num_heads=H,
        return_probs=return_probs, use_roll=use_roll, onehot=onehot)

    context = ctx.reshape(B, H, L, d).transpose(0, 2, 1, 3).reshape(B, L, H * d)
    return {
        "hidden_states": context,
        "attention_probs": None if probs is None else probs.reshape(B, H, L, L),
        "attention_logits": None if logits is None else logits.reshape(B, H, L, L),
    }


# ----------------------------------------------------------------------------- pure-JAX reference
def reference_forward(params, hidden_states, attention_mask, rel_embeddings, *,
                      num_heads, head_dim, att_span):
    B, L, hid = hidden_states.shape
    H, d = num_heads, head_dim

    def lin(x, w, b):
        return x @ w.T + b

    def t4s(x):
        b = x.shape[0]
        return x.reshape(b, -1, H, d).transpose(0, 2, 1, 3).reshape(b * H, -1, d)

    q = t4s(lin(hidden_states, params["wq"], params["bq"]))
    k = t4s(lin(hidden_states, params["wk"], params["bk"]))
    v = t4s(lin(hidden_states, params["wv"], params["bv"]))
    scale_factor = 3
    scale = 1.0 / math.sqrt(d * scale_factor)
    scores = jnp.einsum("bqd,bkd->bqk", q, k * scale)

    rel = rel_embeddings[None]
    pk = jnp.tile(t4s(lin(rel, params["wpk"], params["bpk"])), (B, 1, 1))
    pq = jnp.tile(t4s(lin(rel, params["wpq"], params["bpq"])), (B, 1, 1))
    relpos = jnp.arange(L)[:, None] - jnp.arange(L)[None, :]
    c2p_pos = jnp.clip(relpos + att_span, 0, 2 * att_span - 1)
    idx = jnp.broadcast_to(c2p_pos[None], (B * H, L, L))
    c2p = jnp.take_along_axis(jnp.einsum("bqd,brd->bqr", q, pk * scale), idx, axis=-1)
    p2c = jnp.take_along_axis(jnp.einsum("brd,bkd->brk", pq * scale, k), idx, axis=-2)
    scores = scores + c2p + p2c
    scores = scores - jnp.max(scores, axis=-1, keepdims=True)
    scores = scores.reshape(B, H, L, L)
    valid = attention_mask[:, None, :, :] > 0
    probs = jax.nn.softmax(jnp.where(valid, scores, -jnp.inf), axis=-1)
    probs = jnp.where(valid, probs, 0.0)
    ctx = jnp.einsum("bhqk,bhkd->bhqd", probs, v.reshape(B, H, L, d))
    ctx = ctx.transpose(0, 2, 1, 3).reshape(B, L, H * d)
    return {"hidden_states": ctx, "attention_probs": probs, "attention_logits": scores}


# ----------------------------------------------------------------------------- main
if __name__ == "__main__":
    # config: hidden_size=32, num_attention_heads=4, max_position_embeddings=16,
    #         relative_attention=True, pos_att_type='c2p|p2c', share_att_key=False
    B, L, HID = 2, 8, 32
    H = 4
    D = HID // H
    ATT_SPAN = 16            # max_relative_positions == pos_ebd_size

    key = jax.random.PRNGKey(0)
    ks = jax.random.split(key, 13)

    def init_lin(kw, kb, out_dim, in_dim):
        w = jax.random.normal(kw, (out_dim, in_dim), jnp.float32) * 0.05
        b = jax.random.normal(kb, (out_dim,), jnp.float32) * 0.05
        return w, b

    params = {}
    params["wq"], params["bq"] = init_lin(ks[0], ks[1], H * D, HID)
    params["wk"], params["bk"] = init_lin(ks[2], ks[3], H * D, HID)
    params["wv"], params["bv"] = init_lin(ks[4], ks[5], H * D, HID)
    params["wpk"], params["bpk"] = init_lin(ks[6], ks[7], H * D, HID)   # pos_key_proj
    params["wpq"], params["bpq"] = init_lin(ks[8], ks[9], H * D, HID)   # pos_query_proj

    hidden_states = jax.random.normal(ks[10], (B, L, HID), jnp.float32)
    rel_embeddings = jax.random.normal(ks[11], (2 * ATT_SPAN, HID), jnp.float32) * 0.1
    attention_mask = jnp.ones((B, L, L), jnp.float32)
    attention_mask = attention_mask.at[1, :, 6:].set(0.0)   # mask last 2 keys of batch 1

    ref = reference_forward(params, hidden_states, attention_mask, rel_embeddings,
                            num_heads=H, head_dim=D, att_span=ATT_SPAN)

    # 1) f32 path, full module outputs.
    out = forward(params, hidden_states, attention_mask, rel_embeddings,
                  num_heads=H, head_dim=D, att_span=ATT_SPAN,
                  compute_dtype=jnp.float32, return_probs=True)
    jax.block_until_ready(out)
    for name in ("hidden_states", "attention_probs", "attention_logits"):
        np.testing.assert_allclose(np.asarray(out[name]), np.asarray(ref[name]),
                                   rtol=1e-4, atol=1e-4)

    # 2) bf16-operand MXU path (f32 accumulation + f32 softmax), loose tolerance.
    out_bf16 = forward(params, hidden_states, attention_mask, rel_embeddings,
                       num_heads=H, head_dim=D, att_span=ATT_SPAN,
                       compute_dtype=jnp.bfloat16, return_probs=True)
    jax.block_until_ready(out_bf16)
    for name in ("hidden_states", "attention_probs", "attention_logits"):
        np.testing.assert_allclose(np.asarray(out_bf16[name]), np.asarray(ref[name]),
                                   rtol=3e-2, atol=3e-2)

    # 3) context-only path (drops the two (B,H,L,L) HBM writebacks).
    out_ctx = forward(params, hidden_states, attention_mask, rel_embeddings,
                      num_heads=H, head_dim=D, att_span=ATT_SPAN,
                      compute_dtype=jnp.float32, return_probs=False)
    jax.block_until_ready(out_ctx)
    np.testing.assert_allclose(np.asarray(out_ctx["hidden_states"]),
                               np.asarray(ref["hidden_states"]),
                               rtol=1e-4, atol=1e-4)

    print("KERNEL_OK")
</pallas_src>

<mosaic_0001>
module attributes {stable_mosaic.version = 11 : i64} {
  func.func @_linear_kernel(%arg0: i32, %arg1: memref<16x32xf32, #tpu.memory_space<vmem>>, %arg2: memref<96x32xf32, #tpu.memory_space<vmem>>, %arg3: memref<1x96xf32, #tpu.memory_space<vmem>>, %arg4: memref<16x96xf32, #tpu.memory_space<vmem>>) attributes {dimension_semantics = [#tpu.dimension_semantics<parallel>], iteration_bounds = array<i64: 1>, scalar_prefetch = 0 : i64, scratch_operands = 0 : i64, tpu.core_type = #tpu.core_type<tc>, window_params = [{transform_indices = @transform_0, window_bounds = array<i64: 16, 32>}, {pipeline_mode = #tpu.pipeline_mode<synchronous>, transform_indices = @transform_1, window_bounds = array<i64: 96, 32>}, {pipeline_mode = #tpu.pipeline_mode<synchronous>, transform_indices = @transform_2, window_bounds = array<i64: 1, 96>}, {transform_indices = @transform_3, window_bounds = array<i64: 16, 96>}]} {
    %c0 = arith.constant 0 : index
    %c0_0 = arith.constant 0 : index
    %0 = vector.load %arg1[%c0, %c0_0] : memref<16x32xf32, #tpu.memory_space<vmem>>, vector<16x32xf32>
    %c0_1 = arith.constant 0 : index
    %c0_2 = arith.constant 0 : index
    %1 = vector.load %arg2[%c0_1, %c0_2] : memref<96x32xf32, #tpu.memory_space<vmem>>, vector<96x32xf32>
    %cst = arith.constant dense<0.000000e+00> : vector<16x96xf32>
    %2 = tpu.matmul %0, %1, %cst {dimension_numbers = #tpu.dot_dimension_numbers<[1], [1], [0], [0], [0, 0, 1, 0], [], []>} : vector<16x32xf32>, vector<96x32xf32>, vector<16x96xf32> -> vector<16x96xf32>
    %c0_3 = arith.constant 0 : index
    %c0_4 = arith.constant 0 : index
    %3 = vector.load %arg3[%c0_3, %c0_4] : memref<1x96xf32, #tpu.memory_space<vmem>>, vector<1x96xf32>
    %4 = vector.broadcast %3 : vector<1x96xf32> to vector<16x96xf32>
    %5 = arith.addf %2, %4 : vector<16x96xf32>
    %c0_5 = arith.constant 0 : index
    %c0_6 = arith.constant 0 : index
    %6 = vector.load %arg4[%c0_5, %c0_6] : memref<16x96xf32, #tpu.memory_space<vmem>>, vector<16x96xf32>
    tpu.vector_store %arg4[%c0_5, %c0_6], %5 {strides = array<i32>} : memref<16x96xf32, #tpu.memory_space<vmem>>, vector<16x96xf32>,
    return
  }
  func.func @transform_0(%arg0: i32) -> (i32, i32) {
    %c0_i32 = arith.constant 0 : i32
    %c0_i32_0 = arith.constant 0 : i32
    return %arg0, %c0_i32 : i32, i32
  }
  func.func @transform_1(%arg0: i32) -> (i32, i32) {
    %c0_i32 = arith.constant 0 : i32
    %c0_i32_0 = arith.constant 0 : i32
    %c0_i32_1 = arith.constant 0 : i32
    return %c0_i32, %c0_i32_0 : i32, i32
  }
  func.func @transform_2(%arg0: i32) -> (i32, i32) {
    %c0_i32 = arith.constant 0 : i32
    %c0_i32_0 = arith.constant 0 : i32
    %c0_i32_1 = arith.constant 0 : i32
    return %c0_i32, %c0_i32_0 : i32, i32
  }
  func.func @transform_3(%arg0: i32) -> (i32, i32) {
    %c0_i32 = arith.constant 0 : i32
    %c0_i32_0 = arith.constant 0 : i32
    return %arg0, %c0_i32 : i32, i32
  }
}

</mosaic_0001>

<bundles_post_ra>
// kernel: tpu_custom_call.1
= control target key start
LH: loop header
LB: loop body
LE: loop exit
PB: predicated region body
PF: predicated region fallthrough
CT: control target
= control target key end

     0   :  { %vm36_vm0 = vcmask 261120   ;;  %s351_s0 = inlined_call_operand.vmem [shape: f32[16,32], index: 0, kind: input, shape index: {}]   ;;  %s352_s1 = inlined_call_operand.vmem [shape: f32[96,32], index: 1, kind: input, shape index: {}]   ;;  %s353_s2 = inlined_call_operand.vmem [shape: f32[1,96], index: 2, kind: input, shape index: {}]   ;;  %s354_s3 = inlined_call_operand.hbm [shape: f32[16,96], index: 3, kind: output, shape index: {}]  }
   0x1   :  { %v28_v0 = vld [vmem:[%s352_s1 + $0x58] sm:$0xff]  ;;  %v27_v1 = vld [vmem:[%s352_s1 + $0x50] sm:$0xff]  ;;  %v26_v2 = vld [vmem:[%s352_s1 + $0x48] sm:$0xff] }
   0x2   :  { %202 = vmatprep.subr.msk.mxu0 %vm36_vm0, %v28_v0  ;;  %v15_v3 = vld [vmem:[%s351_s0] sm:$0xff] }
   0x3   :  { %203 = vmatpush3.xpose.msk.msra.mxu0 %vm36_vm0, %v28_v0 }
   0x4   :  { %204 = vmatprep.subr.msk.mxu0 %vm36_vm0, %v27_v1 }
   0x5   :  { %8 = vsyncpa [#allocation3], 0  ;;  %226 = vmatprep.mubr.msk.f32.mxu0 %vm36_vm0, %v15_v3  ;;  %v25_v4 = vld [vmem:[%s352_s1 + $0x40] sm:$0xff]  ;;  %v24_v5 = vld [vmem:[%s352_s1 + $0x38] sm:$0xff]  ;;  %s254_s15 = smov [#allocation2]   ;;  %vm154_vm1 = vcmask 785408  }
   0x6   :  { %v23_v6 = vld [vmem:[%s352_s1 + $0x30] sm:$0xff]  ;;  %v22_v7 = vld [vmem:[%s352_s1 + $0x28] sm:$0xff]  ;;  %v21_v8 = vld [vmem:[%s352_s1 + $0x20] sm:$0xff]  ;;  %s162_s16 = sshll.u32 %s254_s15, 4  ;;  %s163_s16 = int_to_ptr.vmem [resolvable:$true] %s162_s16 }
   0x7   :  { %205 = vmatpush3.xpose.msk.msra.mxu0 %vm36_vm0, %v27_v1  ;;  %v20_v9 = vld [vmem:[%s352_s1 + $0x18] sm:$0xff]  ;;  %v19_v10 = vld [vmem:[%s352_s1 + $0x10] sm:$0xff]  ;;  %v18_v11 = vld [vmem:[%s352_s1 + $0x8] sm:$0xff]  ;;  %p237_p1 = scmp.lt.s32.totalorder %s163_s16, %s163_s16 }
   0x8   :  { %206 = vmatprep.subr.msk.mxu0 %vm36_vm0, %v26_v2  ;;  %v17_v12 = vld [vmem:[%s352_s1] sm:$0xff]  ;;  %v16_v13 = vld [vmem:[%s351_s0 + $0x8] sm:$0xff]  ;;  %s232_s1 = scalar_lea.vmem %s163_s16, 256 }
   0x9   :  { %v173_v14 = vld [vmem:[%s353_s2] ss:$0 sm:$0xff]  ;;  %p233_p0 = scmp.ne.s32.totalorder %s163_s16, %s232_s1  ;;  %p238_p2 = scmp.lt.s32.totalorder %s232_s1, %s232_s1 }
   0xb   :  { %207 = vmatpush3.xpose.msk.msra.mxu0 %vm36_vm0, %v26_v2  ;;  %p239_p3 = por %p238_p2, %p237_p1 }
   0xc   :  { %208 = vmatprep.subr.msk.mxu0 %vm36_vm0, %v25_v4 }
   0xd   :  { %p240_p4 = pnand %p239_p3, %p233_p0 }
   0xf   :  { %209 = vmatpush3.xpose.msk.msra.mxu0 %vm36_vm0, %v25_v4 }
  0x10   :  { %210 = vmatprep.subr.msk.mxu0 %vm36_vm0, %v24_v5 }
  0x13   :  { %211 = vmatpush3.xpose.msk.msra.mxu0 %vm36_vm0, %v24_v5 }
  0x14   :  { %212 = vmatprep.subr.msk.mxu0 %vm36_vm0, %v23_v6 }
  0x17   :  { %213 = vmatpush3.xpose.msk.msra.mxu0 %vm36_vm0, %v23_v6 }
  0x18   :  { %214 = vmatprep.subr.msk.mxu0 %vm36_vm0, %v22_v7 }
  0x1b   :  { %215 = vmatpush3.xpose.msk.msra.mxu0 %vm36_vm0, %v22_v7 }
  0x1c   :  { %216 = vmatprep.subr.msk.mxu0 %vm36_vm0, %v21_v8 }
  0x1f   :  { %217 = vmatpush3.xpose.msk.msra.mxu0 %vm36_vm0, %v21_v8 }
  0x20   :  { %218 = vmatprep.subr.msk.mxu0 %vm36_vm0, %v20_v9 }
  0x23   :  { %219 = vmatpush3.xpose.msk.msra.mxu0 %vm36_vm0, %v20_v9 }
  0x24   :  { %220 = vmatprep.subr.msk.mxu0 %vm36_vm0, %v19_v10 }
  0x27   :  { %221 = vmatpush3.xpose.msk.msra.mxu0 %vm36_vm0, %v19_v10 }
  0x28   :  { %222 = vmatprep.subr.msk.mxu0 %vm36_vm0, %v18_v11 }
  0x2b   :  { %223 = vmatpush3.xpose.msk.msra.mxu0 %vm36_vm0, %v18_v11 }
  0x2c   :  { %224 = vmatprep.subr.msk.mxu0 %vm36_vm0, %v17_v12 }
  0x2f   :  { %225 = vmatpush3.xpose.msk.msra.mxu0 %vm36_vm0, %v17_v12 }
  0x32   :  { %227 = vmatmul.mubr.msk.f32.vlgmr.msra.gmra.mxu0 %vm36_vm0, %v16_v13 }
  0xf2   :  { %v228_v15 = vpop.f32.mrf.mxu0 }
  0xf3   :  { %v151_v16 = vadd.f32 %v228_v15, %v173_v14 }
  0xf4   :  { %v145_v17 = vpop.f32.mrf.mxu0 }
  0xf5   :  { %156 = vst.msk [vmem:[#allocation2 + $0x8] sm:$0xff] %vm154_vm1, %v151_v16  ;;  %v146_v18 = vadd.f32 %v173_v14, %v145_v17 }
  0xf7   :  { %155 = vst.msk [vmem:[#allocation2] sm:$0xff] %vm154_vm1, %v146_v18 }
  0xf8   :  { %243 = shalt.err (!%p240_p4)
}
  0xf9   :  { %s255_s0 = smov 128   ;;  %s256_s17 = smov 8  }
  0xfa   :  { %168 = dma.vmem_to_hbm [thread:$0]  %s163_s16, 256, %s354_s3, [#allocation3], %s255_s0, %s255_s0, %s256_s17  }
  0xfb   :  { %252 = dma.done.wait [#allocation3], 256  }
  0xfc   :  { %253 = vsyncadd [#allocation3], 4294967040 }
  0xfd   :  { %172 = vsyncpa [#allocation3], 1 }

</bundles_post_ra>
